<compile_context>
chip_gen: v6e
topology: v6e:2x2x1
jax: 0.10.0
libtpu: 0.0.40
codegen_flags: <defaults>
</compile_context>

<pallas_src>
import functools
import math

import jax
import jax.numpy as jnp
from jax.experimental import pallas as pl
from jax.experimental.pallas import tpu as pltpu


def get_kernel_num(C, gamma=2, b=1):
    t = math.log2(C) / gamma + b / gamma
    floor = math.floor(t)
    return floor + (1 - floor % 2)


def channel_attention_kernel(x_ref, band_ref, rows_ref, o_ref,
                             sum_ref, max_ref, *, hw, hw_tile):
    """Grid = (B, n_spatial_tiles); spatial axis is the (last) reduction axis.

    x_ref    : VMEM (1, C, hw_tile) input block (f32 or bf16)
    band_ref : VMEM (C, C) banded Conv1d(k, pad=k//2) matrix (raw conv weights)
    rows_ref : VMEM (3, C) rows: [(0.5+alpha)/HW, (0.5+beta), conv bias]
    o_ref    : VMEM (1, 1, C) output block (sigmoid attention weights)
    sum_ref  : VMEM (1, C) running spatial sum (f32 scratch)
    max_ref  : VMEM (1, C) running spatial max (input-dtype scratch)
    """
    s = pl.program_id(1)
    n_s = pl.num_programs(1)

    @pl.when(s == 0)
    def _init():
        sum_ref[...] = jnp.zeros_like(sum_ref)
        max_ref[...] = jnp.full_like(max_ref, -jnp.inf)

    def _accumulate(mask_tail):
        x = x_ref[...]                                        # (1, C, hw_tile)
        if mask_tail:
            # Last tile overhangs HW: zero-pad the sum path, -inf-pad the max
            # path (zero padding would corrupt max when activations are < 0).
            lane = jax.lax.broadcasted_iota(jnp.int32, x.shape, 2)
            valid = (s * hw_tile + lane) < hw
            xs = jnp.where(valid, x, jnp.zeros_like(x))
            xm = jnp.where(valid, x, jnp.full_like(x, -jnp.inf))
        else:
            xs = x
            xm = x
        # f32 accumulation for the sum; max stays in the input dtype (cast
        # only once, in the finalize block).
        sum_ref[...] += jnp.sum(xs, axis=-1, dtype=jnp.float32)
        max_ref[...] = jnp.maximum(max_ref[...], jnp.max(xm, axis=-1))

    if hw % hw_tile != 0:
        # Only the last spatial tile can be partial: keep the hot path clean.
        @pl.when(s != n_s - 1)
        def _full_tiles():
            _accumulate(mask_tail=False)

        @pl.when(s == n_s - 1)
        def _tail_tile():
            _accumulate(mask_tail=True)
    else:
        _accumulate(mask_tail=False)

    @pl.when(s == n_s - 1)
    def _finalize():
        ca_row = rows_ref[0:1, :]          # (0.5 + alpha) / HW  (avg + 1/HW fold)
        cb_row = rows_ref[1:2, :]          # (0.5 + beta)
        bias_row = rows_ref[2:3, :]        # conv1d bias
        # F_add = (0.5+alpha)*F_avg + (0.5+beta)*F_max, with F_avg = sum/HW.
        f_mix = ca_row * sum_ref[...] + cb_row * max_ref[...].astype(jnp.float32)
        out = jnp.dot(f_mix, band_ref[...],
                      preferred_element_type=jnp.float32) + bias_row
        o_ref[...] = jax.nn.sigmoid(out).astype(o_ref.dtype).reshape(o_ref.shape)


def _pick_hw_tile(HW, itemsize, C, target_block_bytes=4 << 20):
    """Spatial (lane) tile for the (1, C, hw_tile) input block.

    Always bounded by the per-block VMEM budget (no full-HW fallback for
    non-128-aligned sizes).  Prefers a multiple-of-128 exact divisor of HW
    (no masked tail); otherwise returns the largest multiple of 128 under
    budget and the kernel masks the overhanging tail of the last block.
    """
    max_lanes = max(128, (target_block_bytes // (C * itemsize)) // 128 * 128)
    if HW <= max_lanes:
        return HW                          # whole spatial extent in one block
    best_div = 0
    t = 128
    while t <= max_lanes:
        if HW % t == 0:
            best_div = t
        t += 128
    if best_div >= max_lanes // 2:         # good-enough exact divisor: no tail
        return best_div
    return max_lanes                       # bounded tile; kernel masks the tail


def _build_conv_params(conv_w, conv_b, alpha, beta, C, HW):
    """Parameter-only tensors, built once in the wrapper.

    band : (C, C) banded matrix implementing Conv1d(1->1, k, pad=k//2) over the
           channel axis (zero boundary), applied as row-vector @ band.
    rows : (3, C) broadcast rows [(0.5+alpha)/HW, (0.5+beta), bias].
    """
    w = jnp.asarray(conv_w, jnp.float32).reshape(-1)          # (k,)
    k = int(w.shape[0])
    pad = k // 2
    row = jnp.arange(C, dtype=jnp.int32)[:, None]             # c_in
    col = jnp.arange(C, dtype=jnp.int32)[None, :]             # c_out
    band = jnp.zeros((C, C), jnp.float32)
    for j in range(k):                                        # k is static & tiny
        band = band + jnp.where(row - col == (j - pad), w[j], 0.0)
    ca = (jnp.float32(0.5) + jnp.asarray(alpha, jnp.float32).reshape(())) / jnp.float32(HW)
    cb = jnp.float32(0.5) + jnp.asarray(beta, jnp.float32).reshape(())
    bias = jnp.asarray(conv_b, jnp.float32).reshape(())
    rows = jnp.broadcast_to(jnp.stack([ca, cb, bias])[:, None], (3, C))
    return band, rows


@functools.partial(jax.jit, static_argnames=("hw_tile", "x_buffers"))
def channel_attention(x, alpha, beta, conv_w, conv_b, hw_tile=None, x_buffers=3):
    """x: (B, C, H, W) -> (B, C, 1, 1) sigmoid channel-attention weights."""
    B, C, H, W = x.shape
    HW = H * W
    x_flat = x.reshape(B, C, HW)            # spatial on the lane axis (keep layout)

    if hw_tile is None:
        hw_tile = _pick_hw_tile(HW, x.dtype.itemsize, C)
    hw_tile = min(int(hw_tile), HW)
    n_s = pl.cdiv(HW, hw_tile)

    band, rows = _build_conv_params(conv_w, conv_b, alpha, beta, C, HW)

    kernel = functools.partial(channel_attention_kernel, hw=HW, hw_tile=hw_tile)

    x_idx = lambda bi, si: (bi, 0, si)
    if x_buffers and x_buffers > 2:
        # Deeper buffering on the pure-DMA input stream (review item).
        x_spec = pl.BlockSpec((1, C, hw_tile), x_idx,
                              pipeline_mode=pl.Buffered(x_buffers))
    else:
        x_spec = pl.BlockSpec((1, C, hw_tile), x_idx)

    cost = pl.CostEstimate(
        flops=int(2 * B * C * HW + 2 * B * C * C + 8 * B * C),
        transcendentals=int(B * C),
        bytes_accessed=int(B * C * HW * x.dtype.itemsize
                           + C * C * 4 + 3 * C * 4
                           + B * C * x.dtype.itemsize),
    )

    out = pl.pallas_call(
        kernel,
        out_shape=jax.ShapeDtypeStruct((B, 1, C), x.dtype),
        grid_spec=pltpu.PrefetchScalarGridSpec(
            num_scalar_prefetch=0,
            grid=(B, n_s),
            in_specs=[
                x_spec,                                           # streamed input
                pl.BlockSpec((C, C), lambda bi, si: (0, 0)),      # band (loop-invariant)
                pl.BlockSpec((3, C), lambda bi, si: (0, 0)),      # ca/cb/bias rows
            ],
            out_specs=pl.BlockSpec((1, 1, C), lambda bi, si: (bi, 0, 0)),
            scratch_shapes=[pltpu.VMEM((1, C), jnp.float32),      # running sum (f32)
                            pltpu.VMEM((1, C), x.dtype)],         # running max (in dtype)
        ),
        compiler_params=pltpu.CompilerParams(
            # TODO(synk): switch batch axis to pltpu.CORE_PARALLEL on v7x once
            # core-sharding is verified in the Mosaic dump.
            dimension_semantics=("parallel", "arbitrary"),
            vmem_limit_bytes=32 * 1024 * 1024,
        ),
        cost_estimate=cost,
    )(x_flat, band, rows)

    return out.reshape(B, C, 1, 1)


def channel_attention_ref(x, alpha, beta, conv_w, conv_b):
    """Pure-JAX reference mirroring the PyTorch forward."""
    B, C, H, W = x.shape
    xf = x.astype(jnp.float32)
    f_avg = jnp.mean(xf, axis=(2, 3))                 # (B, C)
    f_max = jnp.max(xf, axis=(2, 3))                  # (B, C)
    f_add = 0.5 * (f_avg + f_max) + alpha * f_avg + beta * f_max
    k = conv_w.shape[-1]
    pad = k // 2
    f_padded = jnp.pad(f_add, ((0, 0), (pad, pad)))
    w = conv_w.reshape(-1).astype(jnp.float32)
    out = jnp.zeros_like(f_add)
    for j in range(k):
        out = out + w[j] * f_padded[:, j:j + C]
    out = out + conv_b.reshape(()).astype(jnp.float32)
    return jax.nn.sigmoid(out).reshape(B, C, 1, 1).astype(x.dtype)


if __name__ == "__main__":
    B, C, H, W = 2, 16, 16, 16
    k = get_kernel_num(C)                             # C=16 -> k=3

    key = jax.random.PRNGKey(0)
    kx, kw, kb, kx2 = jax.random.split(key, 4)

    x = jax.random.normal(kx, (B, C, H, W), dtype=jnp.float32)
    # Module parameters (deterministic init in-script).
    alpha = jnp.float32(0.5)                          # nn.Parameter([0.5])
    beta = jnp.float32(0.5)                           # nn.Parameter([0.5])
    conv_w = jax.random.normal(kw, (1, 1, k), dtype=jnp.float32) * 0.3
    conv_b = jax.random.normal(kb, (1,), dtype=jnp.float32) * 0.1

    y_ref = channel_attention_ref(x, alpha, beta, conv_w, conv_b)

    # 1) Default path; probe pl.Buffered(3) once and fall back to the plain
    #    double-buffered BlockSpec if this toolchain rejects pipeline_mode.
    xb = 3
    try:
        y = channel_attention(x, alpha, beta, conv_w, conv_b, x_buffers=xb)
        jax.block_until_ready(y)
    except Exception:
        xb = 0
        y = channel_attention(x, alpha, beta, conv_w, conv_b, x_buffers=xb)
        jax.block_until_ready(y)
    assert y.shape == (B, C, 1, 1), y.shape
    assert jnp.allclose(y, y_ref, atol=1e-5, rtol=1e-5), "mismatch (single block)"

    # 2) Multi-step, 128-aligned spatial reduction (2 tiles, no masking).
    y2 = channel_attention(x, alpha, beta, conv_w, conv_b, hw_tile=128, x_buffers=xb)
    jax.block_until_ready(y2)
    assert jnp.allclose(y2, y_ref, atol=1e-5, rtol=1e-5), "mismatch (tiled reduction)"

    # 3) Non-128-aligned spatial size -> bounded tile + in-kernel masked tail.
    H3, W3 = 15, 10                                   # HW = 150, tile = 128 -> tail of 22
    x3 = jax.random.normal(kx2, (B, C, H3, W3), dtype=jnp.float32)
    y3_ref = channel_attention_ref(x3, alpha, beta, conv_w, conv_b)
    y3 = channel_attention(x3, alpha, beta, conv_w, conv_b, hw_tile=128, x_buffers=xb)
    jax.block_until_ready(y3)
    assert jnp.allclose(y3, y3_ref, atol=1e-5, rtol=1e-5), "mismatch (masked tail)"

    print("KERNEL_OK")
</pallas_src>

<mosaic_0001>
module attributes {stable_mosaic.version = 11 : i64} {
  func.func @channel_attention_kernel(%arg0: i32, %arg1: i32, %arg2: memref<1x16x256xf32, #tpu.memory_space<vmem>>, %arg3: memref<16x16xf32, #tpu.memory_space<vmem>>, %arg4: memref<3x16xf32, #tpu.memory_space<vmem>>, %arg5: memref<1x1x16xf32, #tpu.memory_space<vmem>>, %arg6: memref<1x16xf32, #tpu.memory_space<vmem>>, %arg7: memref<1x16xf32, #tpu.memory_space<vmem>>) attributes {dimension_semantics = [#tpu.dimension_semantics<parallel>, #tpu.dimension_semantics<arbitrary>], iteration_bounds = array<i64: 2, 1>, scalar_prefetch = 0 : i64, scratch_operands = 2 : i64, tpu.core_type = #tpu.core_type<tc>, window_params = [{transform_indices = @transform_0, window_bounds = array<i64: 1, 16, 256>}, {pipeline_mode = #tpu.pipeline_mode<synchronous>, transform_indices = @transform_1, window_bounds = array<i64: 16, 16>}, {pipeline_mode = #tpu.pipeline_mode<synchronous>, transform_indices = @transform_2, window_bounds = array<i64: 3, 16>}, {transform_indices = @transform_3, window_bounds = array<i64: 1, 1, 16>}]} {
    %c0_i32 = arith.constant 0 : i32
    %0 = arith.cmpi eq, %arg1, %c0_i32 : i32
    %1 = arith.extui %0 : i1 to i32
    %c0_i32_0 = arith.constant 0 : i32
    %2 = arith.cmpi ne, %1, %c0_i32_0 : i32
    scf.if %2 {
      %cst_14 = arith.constant 0.000000e+00 : f32
      %15 = vector.broadcast %cst_14 : f32 to vector<1x16xf32>
      %c0_15 = arith.constant 0 : index
      %c0_16 = arith.constant 0 : index
      %16 = vector.load %arg6[%c0_15, %c0_16] : memref<1x16xf32, #tpu.memory_space<vmem>>, vector<1x16xf32>
      tpu.vector_store %arg6[%c0_15, %c0_16], %15 {strides = array<i32>} : memref<1x16xf32, #tpu.memory_space<vmem>>, vector<1x16xf32>,
      %cst_17 = arith.constant 0xFF800000 : f32
      %17 = vector.broadcast %cst_17 : f32 to vector<1x16xf32>
      %c0_18 = arith.constant 0 : index
      %c0_19 = arith.constant 0 : index
      %18 = vector.load %arg7[%c0_18, %c0_19] : memref<1x16xf32, #tpu.memory_space<vmem>>, vector<1x16xf32>
      tpu.vector_store %arg7[%c0_18, %c0_19], %17 {strides = array<i32>} : memref<1x16xf32, #tpu.memory_space<vmem>>, vector<1x16xf32>,
    } else {
    }
    %c0 = arith.constant 0 : index
    %c0_1 = arith.constant 0 : index
    %c0_2 = arith.constant 0 : index
    %3 = vector.load %arg2[%c0, %c0_1, %c0_2] : memref<1x16x256xf32, #tpu.memory_space<vmem>>, vector<1x16x256xf32>
    %c0_3 = arith.constant 0 : index
    %c0_4 = arith.constant 0 : index
    %4 = vector.load %arg6[%c0_3, %c0_4] : memref<1x16xf32, #tpu.memory_space<vmem>>, vector<1x16xf32>
    %cst = arith.constant dense<0.000000e+00> : vector<1x16xf32>
    %5 = vector.multi_reduction <add>, %3, %cst [2] : vector<1x16x256xf32> to vector<1x16xf32>
    %6 = arith.addf %4, %5 : vector<1x16xf32>
    %c0_5 = arith.constant 0 : index
    %c0_6 = arith.constant 0 : index
    %7 = vector.load %arg6[%c0_5, %c0_6] : memref<1x16xf32, #tpu.memory_space<vmem>>, vector<1x16xf32>
    tpu.vector_store %arg6[%c0_5, %c0_6], %6 {strides = array<i32>} : memref<1x16xf32, #tpu.memory_space<vmem>>, vector<1x16xf32>,
    %c0_7 = arith.constant 0 : index
    %c0_8 = arith.constant 0 : index
    %8 = vector.load %arg7[%c0_7, %c0_8] : memref<1x16xf32, #tpu.memory_space<vmem>>, vector<1x16xf32>
    %cst_9 = arith.constant dense<0xFF800000> : vector<1x16xf32>
    %9 = vector.multi_reduction <maximumf>, %3, %cst_9 [2] : vector<1x16x256xf32> to vector<1x16xf32>
    %10 = arith.maximumf %8, %9 : vector<1x16xf32>
    %c0_10 = arith.constant 0 : index
    %c0_11 = arith.constant 0 : index
    %11 = vector.load %arg7[%c0_10, %c0_11] : memref<1x16xf32, #tpu.memory_space<vmem>>, vector<1x16xf32>
    tpu.vector_store %arg7[%c0_10, %c0_11], %10 {strides = array<i32>} : memref<1x16xf32, #tpu.memory_space<vmem>>, vector<1x16xf32>,
    %c0_i32_12 = arith.constant 0 : i32
    %12 = arith.cmpi eq, %arg1, %c0_i32_12 : i32
    %13 = arith.extui %12 : i1 to i32
    %c0_i32_13 = arith.constant 0 : i32
    %14 = arith.cmpi ne, %13, %c0_i32_13 : i32
    scf.if %14 {
      %c0_14 = arith.constant 0 : index
      %c0_15 = arith.constant 0 : index
      %15 = vector.load %arg4[%c0_14, %c0_15] : memref<3x16xf32, #tpu.memory_space<vmem>>, vector<1x16xf32>
      %c1 = arith.constant 1 : index
      %c0_16 = arith.constant 0 : index
      %16 = vector.load %arg4[%c1, %c0_16] : memref<3x16xf32, #tpu.memory_space<vmem>>, vector<1x16xf32>
      %c2 = arith.constant 2 : index
      %c0_17 = arith.constant 0 : index
      %17 = vector.load %arg4[%c2, %c0_17] : memref<3x16xf32, #tpu.memory_space<vmem>>, vector<1x16xf32>
      %c0_18 = arith.constant 0 : index
      %c0_19 = arith.constant 0 : index
      %18 = vector.load %arg6[%c0_18, %c0_19] : memref<1x16xf32, #tpu.memory_space<vmem>>, vector<1x16xf32>
      %19 = arith.mulf %15, %18 : vector<1x16xf32>
      %c0_20 = arith.constant 0 : index
      %c0_21 = arith.constant 0 : index
      %20 = vector.load %arg7[%c0_20, %c0_21] : memref<1x16xf32, #tpu.memory_space<vmem>>, vector<1x16xf32>
      %21 = arith.mulf %16, %20 : vector<1x16xf32>
      %22 = arith.addf %19, %21 : vector<1x16xf32>
      %c0_22 = arith.constant 0 : index
      %c0_23 = arith.constant 0 : index
      %23 = vector.load %arg3[%c0_22, %c0_23] : memref<16x16xf32, #tpu.memory_space<vmem>>, vector<16x16xf32>
      %cst_24 = arith.constant dense<0.000000e+00> : vector<1x16xf32>
      %24 = tpu.matmul %22, %23, %cst_24 {dimension_numbers = #tpu.dot_dimension_numbers<[1], [0], [0], [1], [0, 0, 1, 1], [], []>} : vector<1x16xf32>, vector<16x16xf32>, vector<1x16xf32> -> vector<1x16xf32>
      %25 = arith.addf %24, %17 : vector<1x16xf32>
      %26 = arith.negf %25 : vector<1x16xf32>
      %27 = math.exp %26 : vector<1x16xf32>
      %cst_25 = arith.constant 1.000000e+00 : f32
      %28 = vector.broadcast %cst_25 : f32 to vector<1x16xf32>
      %29 = arith.addf %28, %27 : vector<1x16xf32>
      %30 = arith.divf %28, %29 : vector<1x16xf32>
      %31 = vector.shape_cast %30 : vector<1x16xf32> to vector<1x1x16xf32>
      %c0_26 = arith.constant 0 : index
      %c0_27 = arith.constant 0 : index
      %c0_28 = arith.constant 0 : index
      %32 = vector.load %arg5[%c0_26, %c0_27, %c0_28] : memref<1x1x16xf32, #tpu.memory_space<vmem>>, vector<1x1x16xf32>
      tpu.vector_store %arg5[%c0_26, %c0_27, %c0_28], %31 {strides = array<i32>} : memref<1x1x16xf32, #tpu.memory_space<vmem>>, vector<1x1x16xf32>,
    } else {
    }
    return
  }
  func.func @transform_0(%arg0: i32, %arg1: i32) -> (i32, i32, i32) {
    %c0_i32 = arith.constant 0 : i32
    %c0_i32_0 = arith.constant 0 : i32
    return %arg0, %c0_i32, %arg1 : i32, i32, i32
  }
  func.func @transform_1(%arg0: i32, %arg1: i32) -> (i32, i32) {
    %c0_i32 = arith.constant 0 : i32
    %c0_i32_0 = arith.constant 0 : i32
    %c0_i32_1 = arith.constant 0 : i32
    return %c0_i32, %c0_i32_0 : i32, i32
  }
  func.func @transform_2(%arg0: i32, %arg1: i32) -> (i32, i32) {
    %c0_i32 = arith.constant 0 : i32
    %c0_i32_0 = arith.constant 0 : i32
    %c0_i32_1 = arith.constant 0 : i32
    return %c0_i32, %c0_i32_0 : i32, i32
  }
  func.func @transform_3(%arg0: i32, %arg1: i32) -> (i32, i32, i32) {
    %c0_i32 = arith.constant 0 : i32
    %c0_i32_0 = arith.constant 0 : i32
    %c0_i32_1 = arith.constant 0 : i32
    return %arg0, %c0_i32, %c0_i32_0 : i32, i32, i32
  }
}

</mosaic_0001>

<bundles_post_ra>
// kernel: channel_attention.1
= control target key start
LH: loop header
LB: loop body
LE: loop exit
PB: predicated region body
PF: predicated region fallthrough
CT: control target
= control target key end

     0   :  { %8 = vsyncpa [#allocation5], 0  ;;  %s1205_s0 = inlined_call_operand.vmem [shape: f32[2,16,256], index: 0, kind: input, shape index: {}]   ;;  %s1206_s1 = inlined_call_operand.vmem [shape: f32[16,16], index: 1, kind: input, shape index: {}]   ;;  %s1207_s2 = inlined_call_operand.vmem [shape: f32[3,16], index: 2, kind: input, shape index: {}]   ;;  %s1208_s3 = inlined_call_operand.hbm [shape: f32[2,1,16], index: 3, kind: output, shape index: {}]  }
   0x1   :  { %10 = vsyncpa [#allocation5 + $0x1], 0  ;;  %s987_s12 = smov 0   ;;  %s989_s13 = smov 0  }
   0x2   :  { %s991_s14 = smov 0   ;;  %s993_s15 = smov 0  }
   0x3   :  { %s995_s16 = smov 0   ;;  %s997_s17 = smov 0  }
   0x4 LB: > { %s794_s18 = sadd.s32 4294967295, %s959_s17   ;;  %s795_s19 = sadd.s32 4294967294, %s959_s17   ;;  %s959_s17 = sphi %s997_s17, %s16_s17   ;;  %s955_s16 = sphi %s995_s16, %s1215_s16   ;;  %s951_s15 = sphi %s993_s15, %s1214_s15   ;;  %s947_s14 = sphi %s991_s14, %s1213_s14   ;;  %s943_s13 = sphi %s989_s13, %s1212_s13   ;;  %s939_s12 = sphi %s987_s12, %s1211_s12  }
   0x5   : > { %s28_s20 = sadd.s32 1, %s955_s16  ;;  %s105_s21 = sadd.s32 1, %s947_s14 }
   0x6   : > { %p30_p0 = scmp.ge.s32.totalorder %s28_s20, 2  ;;  %p115_p1 = scmp.ne.s32.totalorder %s947_s14, %s943_s13 }
   0x7   : > { %p116_p2 = scmp.eq.s32.totalorder %s794_s18, 1  ;;  %p121_p3 = scmp.ne.s32.totalorder %s943_s13, %s939_s12 }
   0x8   : > { %s1217_s20 = smov (%p30_p0, %s28_s20), 0  ;;  %p122_p5 = scmp.eq.s32.totalorder %s795_s19, 1 }
   0x9   : > { %p1027_p4 = por %p116_p2, %p115_p1  ;;  %s102_s23 = ssub.s32 %s955_s16, %s1217_s20 }
   0xa   : > { %p798_p6 = scmp.ge.s32.totalorder %s959_s17, 1  ;;  %p103_p7 = scmp.eq.s32.totalorder %s102_s23, 0 }
   0xb   : > { %p1034_p8 = por %p122_p5, %p121_p3  ;;  %p159_p9 = scmp.lt.s32.totalorder %s959_s17, 3 }
   0xc   : > { %s1040_s25 = scalar_select %p103_p7, %s947_s14, %s105_s21  }
   0xd   : > { %p160_p10 = pnand %p798_p6, %p159_p9 }
   0xe   : > { %p187_p11 = scmp.lt.s32.totalorder (!%p160_p10), %s951_s15, 1  ;;  %s184_s21 = sand.u32 (!%p160_p10), 1, %s943_s13  }
   0xf   : > { %163 = sbr.rel (%p160_p10) target bundleno = 578 (0x242), region = 32  ;;  %s803_s23 = sshll.u32 (!%p160_p10), %s951_s15, 4 }
  0x10   : > { %s713_s4 = scalar_lea.sflag (!%p160_p10), [#allocation5], %s184_s21  ;;  %s966_s6 = smov (!%p160_p10), [#allocation4]  }
  0x11   : > { %s887_s7 = sshll.u32 (!%p160_p10), %s966_s6, 4  ;;  %s888_s7 = int_to_ptr.vmem [resolvable:$false] %s887_s7 }
  0x14   : > { %s188_s26 = scalar_select %p187_p11, %s951_s15, 1  ;;  %v961_v8 = vmov 0   ;;  %v216_v9 = vlaneseq  ;;  %v962_v10 = vmov 1966171168   ;;  %vm200_vm0 = vcmask 122880  }
  0x15   : > { %877 = vset.pattern.permute.xlu0 %v961_v8  ;;  %878 = vset.pattern.permute.xlu1 %v961_v8  ;;  %v285_v11 = vunpack.c.l.s4 %v962_v10  ;;  %vm965_vm1 = vmmov 0   ;;  %vm395_vm2 = vcmask 130112   ;;  %vm631_vm3 = vcmask 130048   ;;  %s889_s15 = scalar_lea.vmem %s888_s7, 32 }
  0x16   : > { %s806_s27 = sshll.u32 %s188_s26, 5  ;;  %v1048_v12 = vshrl.u32 %v216_v9, 7  ;;  %s185_s26 = scalar_lea.vmem [#allocation4], %s184_s21 }
  0x17   : > { %s194_s30 = scalar_lea.vmem %s1205_s0, %s806_s27  ;;  %v286_v13 = vunpack.c.0.s8 %v285_v11  ;;  %s725_s27 = sshll.u32 %s185_s26, 4  ;;  %s726_s27 = int_to_ptr.vmem [resolvable:$true] %s725_s27 }
  0x18   : > { %v203_v0 = vld [vmem:[%s194_s30] sm:$0xff]  ;;  %v204_v1 = vld [vmem:[%s194_s30 + $0x8] sm:$0xff]  ;;  %v205_v2 = vld [vmem:[%s194_s30 + $0x10] sm:$0xff]  ;;  %v1051_v14 = vsub.s32 0, %v1048_v12  ;;  %v1054_v15 = vsub.s32 1, %v1048_v12  ;;  %v1057_v16 = vsub.s32 2, %v1048_v12  ;;  %p890_p1 = scmp.lt.s32.totalorder %s726_s27, %s888_s7 }
  0x19   : > { %v208_v3 = vadd.f32 %v204_v1, %v203_v0  ;;  %v206_v4 = vld [vmem:[%s194_s30 + $0x18] sm:$0xff]  ;;  %v416_v5 = vmax.f32 %v203_v0, %v204_v1  ;;  %v1060_v17 = vsub.s32 3, %v1048_v12  ;;  %v1063_v18 = vsub.s32 4, %v1048_v12  ;;  %s1164_s30 = scalar_lea.hbm %s1208_s3, %s803_s23  ;;  %s883_s5 = scalar_lea.vmem %s726_s27, 16 }
  0x1a   : > { %v211_v6 = vadd.f32 %v206_v4, %v205_v2  ;;  %v419_v7 = vmax.f32 %v205_v2, %v206_v4  ;;  %v1066_v19 = vsub.s32 5, %v1048_v12  ;;  %v1069_v20 = vsub.s32 6, %v1048_v12  ;;  %p884_p12 = scmp.ne.s32.totalorder %s726_s27, %s883_s5  ;;  %p891_p2 = scmp.lt.s32.totalorder %s889_s15, %s883_s5 }
  0x1b   : > { %209 = vadd.xlane.f32.xlu0 %v208_v3  ;;  %417 = vmax.xlane.f32.xlu1 %v416_v5  ;;  %v1072_v21 = vsub.s32 7, %v1048_v12  ;;  %v1075_v24 = vsub.s32 %v286_v13, %v1048_v12 }
  0x1c   : > { %p885_p13 = pnand %p884_p12, %p1027_p4  ;;  %p892_p3 = por %p891_p2, %p890_p1 }
  0x1e   : > { %p886_p0 = pneg %p885_p13 }
  0x1f   : > { %212 = vadd.xlane.f32.xlu0 %v211_v6  ;;  %420 = vmax.xlane.f32.xlu1 %v419_v7 }
  0x20   : > { %p893_p5 = pnand %p892_p3, %p886_p0 }
  0xa4   : > { %v210_v22 = vpop.xlane.xlu0 %209  ;;  %v418_v23 = vpop.xlane.xlu1 %417 }
  0xa5   : > { %v219_v25 = vrot.slane %v210_v22, %v1051_v14  ;;  %v223_v26 = vrot.slane %v210_v22, %v1054_v15  ;;  %v227_v27 = vrot.slane %v210_v22, %v1057_v16  ;;  %v231_v28 = vrot.slane %v210_v22, %v1060_v17 }
  0xa6   : > { %v235_v29 = vrot.slane %v210_v22, %v1063_v18  ;;  %v239_v30 = vrot.slane %v210_v22, %v1066_v19  ;;  %v243_v31 = vrot.slane %v210_v22, %v1069_v20  ;;  %v247_v32 = vrot.slane %v210_v22, %v1072_v21 }
  0xa7   : > { %v280_v33 = vcombine.low %v219_v25, %v223_v26  ;;  %v281_v34 = vcombine.low %v227_v27, %v231_v28  ;;  %v427_v35 = vrot.slane %v418_v23, %v1051_v14  ;;  %v431_v36 = vrot.slane %v418_v23, %v1054_v15 }
  0xa8   : > { %v213_v37 = vpop.xlane.xlu0 %212  ;;  %v282_v38 = vcombine.low %v235_v29, %v239_v30  ;;  %v283_v39 = vcombine.low %v243_v31, %v247_v32  ;;  %v435_v40 = vrot.slane %v418_v23, %v1057_v16  ;;  %v439_v41 = vrot.slane %v418_v23, %v1060_v17  ;;  %v421_v62 = vpop.xlane.xlu1 %420 }
  0xa9   : > { %v290_v42 = vrot.slane %v280_v33, %v1075_v24  ;;  %v297_v43 = vrot.slane %v281_v34, %v1075_v24  ;;  %v251_v44 = vrot.slane %v213_v37, %v1051_v14  ;;  %v255_v45 = vrot.slane %v213_v37, %v1054_v15 }
  0xaa   : > { %v304_v46 = vrot.slane %v282_v38, %v1075_v24  ;;  %v311_v47 = vrot.slane %v283_v39, %v1075_v24  ;;  %v259_v48 = vrot.slane %v213_v37, %v1057_v16  ;;  %v263_v49 = vrot.slane %v213_v37, %v1060_v17 }
  0xab   : > { %v312_v50 = vcombine.low %v290_v42, %v297_v43  ;;  %v267_v51 = vrot.slane %v213_v37, %v1063_v18  ;;  %v271_v52 = vrot.slane %v213_v37, %v1066_v19  ;;  %v275_v53 = vrot.slane %v213_v37, %v1069_v20 }
  0xac   : > { %v313_v54 = vcombine.low %v304_v46, %v311_v47  ;;  %v279_v55 = vrot.slane %v213_v37, %v1072_v21  ;;  %v329_v56 = vcombine.low %v251_v44, %v255_v45  ;;  %v330_v57 = vcombine.low %v259_v48, %v263_v49 }
  0xad   : > { %v320_v58 = vrot.slane %v312_v50, %v1075_v24  ;;  %v331_v59 = vcombine.low %v267_v51, %v271_v52  ;;  %v443_v60 = vrot.slane %v418_v23, %v1063_v18  ;;  %v447_v61 = vrot.slane %v418_v23, %v1066_v19  ;;  %v630_v52 = vld [vmem:[%s1206_s1 + $0x8] sm:$0xff] }
  0xae   : > { %v327_v63 = vrot.slane %v313_v54, %v1075_v24  ;;  %v332_v0 = vcombine.low %v275_v53, %v279_v55  ;;  %v339_v1 = vrot.slane %v329_v56, %v1075_v24  ;;  %v346_v2 = vrot.slane %v330_v57, %v1075_v24  ;;  %v629_v53 = vld [vmem:[%s1206_s1] sm:$0xff] }
  0xaf   : > { %v353_v3 = vrot.slane %v331_v59, %v1075_v24  ;;  %v451_v4 = vrot.slane %v418_v23, %v1069_v20  ;;  %v455_v5 = vrot.slane %v418_v23, %v1072_v21  ;;  %v488_v6 = vcombine.low %v427_v35, %v431_v36 }
  0xb0   : > { %v328_v7 = vcombine.low %v320_v58, %v327_v63  ;;  %v360_v8 = vrot.slane %v332_v0, %v1075_v24  ;;  %v361_v10 = vcombine.low %v339_v1, %v346_v2  ;;  %v489_v11 = vcombine.low %v435_v40, %v439_v41 }
  0xb1   : > { %v490_v13 = vcombine.low %v443_v60, %v447_v61  ;;  %v491_v22 = vcombine.low %v451_v4, %v455_v5  ;;  %v498_v25 = vrot.slane %v488_v6, %v1075_v24  ;;  %v459_v26 = vrot.slane %v421_v62, %v1051_v14 }
  0xb2   : > { %379 = vperm.xlu0 %877, %v328_v7   ;;  %v362_v27 = vcombine.low %v353_v3, %v360_v8  ;;  %v369_v28 = vrot.slane %v361_v10, %v1075_v24  ;;  %v505_v29 = vrot.slane %v489_v11, %v1075_v24  ;;  %v463_v23 = vrot.slane %v421_v62, %v1054_v15  ;;  %v621_v11 = vld [vmem:[%s1207_s2] sm:$0x1] }
  0xb3   : > { %v512_v30 = vrot.slane %v490_v13, %v1075_v24  ;;  %v519_v31 = vrot.slane %v491_v22, %v1075_v24  ;;  %v467_v32 = vrot.slane %v421_v62, %v1057_v16  ;;  %v471_v33 = vrot.slane %v421_v62, %v1060_v17  ;;  %v622_v13 = vld [vmem:[%s1207_s2 + $0x1] sm:$0x1] }
  0xb4   : > { %v376_v34 = vrot.slane %v362_v27, %v1075_v24  ;;  %v520_v35 = vcombine.low %v498_v25, %v505_v29  ;;  %v475_v14 = vrot.slane %v421_v62, %v1063_v18  ;;  %v479_v36 = vrot.slane %v421_v62, %v1066_v19 }
  0xb5   : > { %v521_v37 = vcombine.low %v512_v30, %v519_v31  ;;  %v483_v38 = vrot.slane %v421_v62, %v1069_v20  ;;  %v487_v15 = vrot.slane %v421_v62, %v1072_v21  ;;  %v537_v39 = vcombine.low %v459_v26, %v463_v23 }
  0xb6   : > { %v377_v40 = vcombine.low %v369_v28, %v376_v34  ;;  %v528_v41 = vrot.slane %v520_v35, %v1075_v24  ;;  %v538_v42 = vcombine.low %v467_v32, %v471_v33  ;;  %v539_v16 = vcombine.low %v475_v14, %v479_v36 }
  0xb7   : > { %v535_v17 = vrot.slane %v521_v37, %v1075_v24  ;;  %v540_v43 = vcombine.low %v483_v38, %v487_v15  ;;  %v547_v44 = vrot.slane %v537_v39, %v1075_v24  ;;  %v963_v46 = vmov -inf  }
  0xb8   : > { %382 = vperm.xlu1 %878, %v377_v40   ;;  %v554_v18 = vrot.slane %v538_v42, %v1075_v24  ;;  %v561_v19 = vrot.slane %v539_v16, %v1075_v24  ;;  %202 = vst.msk [vmem:[#allocation3] sm:$0x1] %vm200_vm0, %v963_v46  ;;  %v964_v48 = vmov 0.0   ;;  %v385_v54 = vand.u32 127, %v216_v9 }
  0xb9   : > { %v536_v20 = vcombine.low %v528_v41, %v535_v17  ;;  %v568_v21 = vrot.slane %v540_v43, %v1075_v24  ;;  %201 = vst.msk [vmem:[#allocation2] sm:$0x1] %vm200_vm0, %v964_v48  ;;  %810 = vmatprep.subr.mxu0 %v964_v48  ;;  %814 = vmatprep.mubr.msk.f32.mxu0 %vm965_vm1, %v964_v48 }
  0xba   : > { %v569_v45 = vcombine.low %v547_v44, %v554_v18  ;;  %811 = vmatpush3.msra.mxu0 %v630_v52  ;;  %v390_v55 = vadd.s32 4294967288, %v385_v54  ;;  %v388_v56 = vsub.s32 %v385_v54, %v1048_v12 }
  0xbb   : > { %v570_v47 = vcombine.low %v561_v19, %v568_v21  ;;  %812 = vmatprep.subr.mxu0 %v964_v48 }
  0xbc   : > { %587 = vperm.xlu1 %878, %v536_v20   ;;  %v577_v49 = vrot.slane %v569_v45, %v1075_v24  ;;  %813 = vmatpush3.msra.mxu0 %v629_v53  ;;  %v393_v57 = vsub.s32 %v390_v55, %v1048_v12 }
  0xbd   : > { %v584_v50 = vrot.slane %v570_v47, %v1075_v24 }
  0xbf   : > { %v585_v51 = vcombine.low %v577_v49, %v584_v50  ;;  %v415_v7 = vld [vmem:[#allocation3] sm:$0x1] }
  0xc0   : > { %v207_v1 = vld [vmem:[#allocation2] sm:$0x1] }
  0xc1   : > { %590 = vperm.xlu1 %878, %v585_v51  }
 0x12d   : > { %v380_v58 = vpop.permute.xlu0 %379 }
 0x12e   : > { %v389_v60 = vrot.slane %v380_v58, %v388_v56 }
 0x133   : > { %v383_v59 = vpop.permute.xlu1 %382 }
 0x134   : > { %v394_v61 = vrot.slane %v383_v59, %v393_v57 }
 0x136   : > { %v396_v62 = vsel %vm395_vm2, %v394_v61, %v389_v60 }
 0x137   : > { %v403_v63 = vrot.slane %v396_v62, %v1075_v24  ;;  %v588_v0 = vpop.permute.xlu1 %587 }
 0x138   : > { %v595_v9 = vrot.slane %v588_v0, %v388_v56 }
 0x139   : > { %v410_v2 = vrot.slane %v403_v63, %v1075_v24 }
 0x13b   : > { %v412_v3 = vadd.f32 %v410_v2, %v207_v1 }
 0x13c   : > { %v591_v4 = vpop.permute.xlu1 %590 }
 0x13d   : > { %v599_v5 = vrot.slane %v591_v4, %v393_v57  ;;  %414 = vst.msk [vmem:[#allocation2] sm:$0x1] %vm200_vm0, %v412_v3 }
 0x13f   : > { %v600_v6 = vsel %vm395_vm2, %v599_v5, %v595_v9 }
 0x140   : > { %v607_v12 = vrot.slane %v600_v6, %v1075_v24 }
 0x142   : > { %v614_v8 = vrot.slane %v607_v12, %v1075_v24  ;;  %v623_v24 = vld [vmem:[%s1207_s2 + $0x2] sm:$0x1] }
 0x144   : > { %v616_v10 = vmax.f32 %v415_v7, %v614_v8  ;;  %v624_v22 = vld [vmem:[#allocation2] sm:$0x1] }
 0x145   : > { %v625_v26 = vmul.f32 %v624_v22, %v621_v11 }
 0x146   : > { %617 = vst.msk [vmem:[#allocation3] sm:$0x1] %vm200_vm0, %v616_v10 }
 0x14d   : > { %v626_v25 = vld [vmem:[#allocation3] sm:$0x1] }
 0x14e   : > { %v627_v27 = vmul.f32 %v626_v25, %v622_v13 }
 0x150   : > { %v628_v28 = vadd.f32 %v627_v27, %v625_v26 }
 0x152   : > { %815 = vmatmul.mubr.msk.f32.vlgmr.msra.gmra.mxu0 %vm631_vm3, %v628_v28 }
 0x212   : > { %v701_v29 = vpop.f32.mrf.mxu0 }
 0x213   : > { %v702_v23 = vadd.f32 %v701_v29, %v623_v24 }
 0x214   : > { %v816_v30 = vpop.f32.mrf.mxu0 }
 0x215   : > { %v802_v31 = vmul.f32 -1.442695, %v702_v23 }
 0x217   : > { %879 = vpow2.f32 %v802_v31 }
 0x224   : > { %v880_v32 = vpop.eup %879 }
 0x225   : > { %v708_v33 = vadd.f32 1.0, %v880_v32 }
 0x227   : > { %881 = vrcp.f32 %v708_v33 }
 0x234   : > { %v882_v34 = vpop.eup %881 }
 0x235   : > { %711 = vst.msk [vmem:[%s185_s26] sm:$0x1] %vm200_vm0, %v882_v34 }
 0x236   : > { %896 = shalt.err (!%p893_p5)
}
 0x237   : > { %s897_s8 = scalar_lea.hbm %s1164_s30, 16  ;;  %s901_s11 = scalar_lea.hbm %s1208_s3, 32 }
 0x238   : > { %p898_p6 = scmp.ne.s32.totalorder %s1164_s30, %s897_s8  ;;  %p902_p10 = scmp.lt.s32.totalorder %s1164_s30, %s1208_s3 }
 0x239   : > { %p903_p11 = scmp.lt.s32.totalorder %s901_s11, %s897_s8 }
 0x23a   : > { %p899_p7 = pnand %p898_p6, %p1027_p4 }
 0x23b   : > { %p904_p12 = por %p903_p11, %p902_p10 }
 0x23c   : > { %p900_p9 = pneg %p899_p7 }
 0x23e   : > { %p905_p13 = pnand %p904_p12, %p900_p9 }
 0x240   : > { %908 = shalt.err (!%p905_p13)
}
 0x241   : > { %817 = dma.vmem_to_hbm [thread:$0]  (%p1027_p4), %s726_s27, 16, %s1164_s30, %s713_s4  }
 0x242 PF: > { %p823_p0 = scmp.ge.s32.totalorder %s959_s17, 2  ;;  %s737_s21 = sand.u32 1, %s939_s12  }
 0x243   : > { %s738_s23 = scalar_lea.sflag [#allocation5], %s737_s21 }
 0x244   : > { %p820_p1 = pnand %p823_p0, %p1034_p8 }
 0x246   : > { %p821_p2 = pneg %p820_p1 }
 0x248   : > { %934 = dma.done.wait (%p821_p2), %s738_s23, 16  }
 0x249   : > { %936 = vsyncadd (%p821_p2), %s738_s23, 4294967280  ;;  %s16_s17 = sadd.s32 1, %s959_s17   ;;  %s1211_s12 = smov %s943_s13 }
 0x24a   : > { %p13_p3 = scmp.ge.s32.totalorder %s16_s17, 4   ;;  %s1212_s13 = smov %s947_s14 }
 0x24b   : > { %s1213_s14 = smov %s1040_s25  ;;  %s1214_s15 = smov %s955_s16 }
 0x24c   : > { %s1215_s16 = smov %s1217_s20  ;;  %15 = sbr.rel (!%p13_p3) target bundleno = 4 (0x4), region = 75 }
 0x251   :  { %742 = vsyncpa [#allocation5], 1 }
 0x252   :  { %744 = vsyncpa [#allocation5 + $0x1], 1 }

</bundles_post_ra>
